<compile_context>
chip_gen: v7x
topology: tpu7x:2x2x1
jax: 0.10.0
libtpu: 0.0.40
codegen_flags: <defaults>
</compile_context>

<pallas_src>
import jax
import jax.numpy as jnp
from jax import lax
from jax.experimental import pallas as pl
from jax.experimental.pallas import tpu as pltpu


def _rpn_kernel(patches_ref, w3_ref, b3_ref, wh_ref, bh_ref, out_ref):
    """Fused conv3x3 + ReLU + fused 1x1 heads for one (batch, pixel-tile).

    patches_ref: (1, 9*Cin, T)     im2col patches, pixels along lanes
    w3_ref     : (Cmid, 9*Cin)     3x3 conv weight, contraction dim last
    b3_ref     : (Cmid, 1)
    wh_ref     : (Ccls+Cbb, Cmid)  fused 1x1 head weight
    bh_ref     : (Ccls+Cbb, 1)
    out_ref    : (1, Ccls+Cbb, T)  fused head output (split in the wrapper)
    """
    patches = patches_ref[0]                                    # (9*Cin, T)
    hid = jnp.dot(w3_ref[...], patches,
                  preferred_element_type=jnp.float32)           # (Cmid, T)
    hid = jnp.maximum(hid + b3_ref[...], 0.0)                   # bias + ReLU
    out = jnp.dot(wh_ref[...], hid,
                  preferred_element_type=jnp.float32) + bh_ref[...]
    out_ref[0] = out.astype(out_ref.dtype)                      # (Ctot, T)


@jax.jit
def rpn_forward(x_nchw, w3_oihw, b3, wc_oihw, bc, wb_oihw, bb):
    """RPN forward. x_nchw: (N, Cin, H, W). Returns (logits, bbox) in NCHW."""
    N, Cin, H, W = x_nchw.shape
    Cmid = w3_oihw.shape[0]
    Ccls = wc_oihw.shape[0]
    Cbb = wb_oihw.shape[0]
    Ctot = Ccls + Cbb
    HW = H * W
    K = 9 * Cin

    # ---- im2col (stays in NCHW — no layout transpose passes) ----
    x_pad = jnp.pad(x_nchw, ((0, 0), (0, 0), (1, 1), (1, 1)))   # spatial pad=1
    taps = [x_pad[:, :, dy:dy + H, dx:dx + W]
            for dy in range(3) for dx in range(3)]              # 9 x (N,Cin,H,W)
    patches = jnp.stack(taps, axis=1).reshape(N, K, HW)         # (N, 9*Cin, HW)

    # conv3x3 weight (O,I,3,3) -> (O,ky,kx,I) -> (Cmid, 9*Cin) matching patches
    w3t = jnp.transpose(w3_oihw, (0, 2, 3, 1)).reshape(Cmid, K)
    # fused 1x1 heads: (Ccls+Cbb, Cmid) and (Ccls+Cbb, 1)
    wht = jnp.concatenate([wc_oihw[:, :, 0, 0], wb_oihw[:, :, 0, 0]], axis=0)
    b3c = b3.reshape(Cmid, 1)
    bhc = jnp.concatenate([bc, bb], axis=0).reshape(Ctot, 1)

    # Pixel-tile size: largest multiple of 128 dividing HW, capped so the
    # double-buffered tiles stay far inside even v7x's 64 MiB VMEM.
    if HW % 128 == 0:
        tile = min(HW, 2048)
        while HW % tile != 0:
            tile -= 128
    else:
        tile = HW                      # small/ragged maps: one full-extent block
    n_tiles = HW // tile

    grid_spec = pltpu.PrefetchScalarGridSpec(
        num_scalar_prefetch=0,
        grid=(N, n_tiles),
        in_specs=[
            pl.BlockSpec((1, K, tile), lambda n, m: (n, 0, m)),
            pl.BlockSpec((Cmid, K), lambda n, m: (0, 0)),
            pl.BlockSpec((Cmid, 1), lambda n, m: (0, 0)),
            pl.BlockSpec((Ctot, Cmid), lambda n, m: (0, 0)),
            pl.BlockSpec((Ctot, 1), lambda n, m: (0, 0)),
        ],
        out_specs=pl.BlockSpec((1, Ctot, tile), lambda n, m: (n, 0, m)),
    )

    out = pl.pallas_call(
        _rpn_kernel,
        out_shape=jax.ShapeDtypeStruct((N, Ctot, HW), jnp.float32),
        grid_spec=grid_spec,
        compiler_params=pltpu.CompilerParams(
            dimension_semantics=("parallel", "parallel")),
    )(patches, w3t, b3c, wht, bhc)

    # split fused head channels and reshape back to NCHW (no transpose needed)
    logits = out[:, :Ccls, :].reshape(N, Ccls, H, W)
    bbox = out[:, Ccls:, :].reshape(N, Cbb, H, W)
    return logits, bbox


def _reference(x, w3, b3, wc, bc, wb, bb):
    """Pure-JAX reference (NCHW, same semantics as the PyTorch module)."""
    dn = ("NCHW", "OIHW", "NCHW")
    h = lax.conv_general_dilated(x, w3, (1, 1), ((1, 1), (1, 1)),
                                 dimension_numbers=dn)
    h = jnp.maximum(h + b3[None, :, None, None], 0.0)
    logits = lax.conv_general_dilated(h, wc, (1, 1), ((0, 0), (0, 0)),
                                      dimension_numbers=dn)
    logits = logits + bc[None, :, None, None]
    bbox = lax.conv_general_dilated(h, wb, (1, 1), ((0, 0), (0, 0)),
                                    dimension_numbers=dn)
    bbox = bbox + bb[None, :, None, None]
    return logits, bbox


if __name__ == "__main__":
    # Small, module-consistent shapes.
    N, Cin, H, W = 2, 4, 16, 16
    Cmid, num_anchors = 32, 9
    Ccls, Cbb = num_anchors * 2, num_anchors * 4

    key = jax.random.PRNGKey(0)
    ks = jax.random.split(key, 7)
    x = jax.random.normal(ks[0], (N, Cin, H, W), jnp.float32)

    # Deterministic parameter init (PyTorch conv layouts: OIHW + per-O bias).
    w3 = jax.random.normal(ks[1], (Cmid, Cin, 3, 3), jnp.float32) * 0.1
    b3 = jax.random.normal(ks[2], (Cmid,), jnp.float32) * 0.1
    wc = jax.random.normal(ks[3], (Ccls, Cmid, 1, 1), jnp.float32) * 0.1
    bc = jax.random.normal(ks[4], (Ccls,), jnp.float32) * 0.1
    wb = jax.random.normal(ks[5], (Cbb, Cmid, 1, 1), jnp.float32) * 0.1
    bb = jax.random.normal(ks[6], (Cbb,), jnp.float32) * 0.1

    logits, bbox = rpn_forward(x, w3, b3, wc, bc, wb, bb)
    jax.block_until_ready((logits, bbox))

    ref_logits, ref_bbox = _reference(x, w3, b3, wc, bc, wb, bb)
    assert logits.shape == (N, Ccls, H, W)
    assert bbox.shape == (N, Cbb, H, W)
    assert jnp.allclose(logits, ref_logits, rtol=1e-4, atol=1e-4)
    assert jnp.allclose(bbox, ref_bbox, rtol=1e-4, atol=1e-4)

    print("KERNEL_OK")
</pallas_src>

<mosaic_0001>
module attributes {stable_mosaic.version = 11 : i64} {
  func.func @_rpn_kernel(%arg0: i32, %arg1: i32, %arg2: memref<1x36x256xf32, #tpu.memory_space<vmem>>, %arg3: memref<32x36xf32, #tpu.memory_space<vmem>>, %arg4: memref<32x1xf32, #tpu.memory_space<vmem>>, %arg5: memref<54x32xf32, #tpu.memory_space<vmem>>, %arg6: memref<54x1xf32, #tpu.memory_space<vmem>>, %arg7: memref<1x54x256xf32, #tpu.memory_space<vmem>>) attributes {dimension_semantics = [#tpu.dimension_semantics<parallel>, #tpu.dimension_semantics<parallel>], iteration_bounds = array<i64: 2, 1>, scalar_prefetch = 0 : i64, scratch_operands = 0 : i64, tpu.core_type = #tpu.core_type<tc>, window_params = [{transform_indices = @transform_0, window_bounds = array<i64: 1, 36, 256>}, {pipeline_mode = #tpu.pipeline_mode<synchronous>, transform_indices = @transform_1, window_bounds = array<i64: 32, 36>}, {pipeline_mode = #tpu.pipeline_mode<synchronous>, transform_indices = @transform_2, window_bounds = array<i64: 32, 1>}, {pipeline_mode = #tpu.pipeline_mode<synchronous>, transform_indices = @transform_3, window_bounds = array<i64: 54, 32>}, {pipeline_mode = #tpu.pipeline_mode<synchronous>, transform_indices = @transform_4, window_bounds = array<i64: 54, 1>}, {transform_indices = @transform_5, window_bounds = array<i64: 1, 54, 256>}]} {
    %c0 = arith.constant 0 : index
    %c0_0 = arith.constant 0 : index
    %c0_1 = arith.constant 0 : index
    %0 = vector.load %arg2[%c0, %c0_0, %c0_1] : memref<1x36x256xf32, #tpu.memory_space<vmem>>, vector<1x36x256xf32>
    %1 = vector.shape_cast %0 : vector<1x36x256xf32> to vector<36x256xf32>
    %c0_2 = arith.constant 0 : index
    %c0_3 = arith.constant 0 : index
    %2 = vector.load %arg3[%c0_2, %c0_3] : memref<32x36xf32, #tpu.memory_space<vmem>>, vector<32x36xf32>
    %cst = arith.constant dense<0.000000e+00> : vector<32x256xf32>
    %3 = tpu.matmul %2, %1, %cst {dimension_numbers = #tpu.dot_dimension_numbers<[1], [0], [0], [1], [0, 0, 1, 1], [], []>} : vector<32x36xf32>, vector<36x256xf32>, vector<32x256xf32> -> vector<32x256xf32>
    %c0_4 = arith.constant 0 : index
    %c0_5 = arith.constant 0 : index
    %4 = vector.load %arg4[%c0_4, %c0_5] : memref<32x1xf32, #tpu.memory_space<vmem>>, vector<32x1xf32>
    %5 = vector.broadcast %4 : vector<32x1xf32> to vector<32x256xf32>
    %6 = arith.addf %3, %5 : vector<32x256xf32>
    %cst_6 = arith.constant 0.000000e+00 : f32
    %7 = vector.broadcast %cst_6 : f32 to vector<32x256xf32>
    %8 = arith.maximumf %6, %7 : vector<32x256xf32>
    %c0_7 = arith.constant 0 : index
    %c0_8 = arith.constant 0 : index
    %9 = vector.load %arg5[%c0_7, %c0_8] : memref<54x32xf32, #tpu.memory_space<vmem>>, vector<54x32xf32>
    %cst_9 = arith.constant dense<0.000000e+00> : vector<54x256xf32>
    %10 = tpu.matmul %9, %8, %cst_9 {dimension_numbers = #tpu.dot_dimension_numbers<[1], [0], [0], [1], [0, 0, 1, 1], [], []>} : vector<54x32xf32>, vector<32x256xf32>, vector<54x256xf32> -> vector<54x256xf32>
    %c0_10 = arith.constant 0 : index
    %c0_11 = arith.constant 0 : index
    %11 = vector.load %arg6[%c0_10, %c0_11] : memref<54x1xf32, #tpu.memory_space<vmem>>, vector<54x1xf32>
    %12 = vector.broadcast %11 : vector<54x1xf32> to vector<54x256xf32>
    %13 = arith.addf %10, %12 : vector<54x256xf32>
    %c0_12 = arith.constant 0 : index
    %c0_13 = arith.constant 0 : index
    %c0_14 = arith.constant 0 : index
    %14 = vector.load %arg7[%c0_12, %c0_13, %c0_14] : memref<1x54x256xf32, #tpu.memory_space<vmem>>, vector<1x54x256xf32>
    %15 = vector.shape_cast %14 : vector<1x54x256xf32> to vector<54x256xf32>
    %16 = vector.shape_cast %13 : vector<54x256xf32> to vector<1x54x256xf32>
    tpu.vector_store %arg7[%c0_12, %c0_13, %c0_14], %16 {strides = array<i32>} : memref<1x54x256xf32, #tpu.memory_space<vmem>>, vector<1x54x256xf32>,
    return
  }
  func.func @transform_0(%arg0: i32, %arg1: i32) -> (i32, i32, i32) {
    %c0_i32 = arith.constant 0 : i32
    %c0_i32_0 = arith.constant 0 : i32
    return %arg0, %c0_i32, %arg1 : i32, i32, i32
  }
  func.func @transform_1(%arg0: i32, %arg1: i32) -> (i32, i32) {
    %c0_i32 = arith.constant 0 : i32
    %c0_i32_0 = arith.constant 0 : i32
    %c0_i32_1 = arith.constant 0 : i32
    return %c0_i32, %c0_i32_0 : i32, i32
  }
  func.func @transform_2(%arg0: i32, %arg1: i32) -> (i32, i32) {
    %c0_i32 = arith.constant 0 : i32
    %c0_i32_0 = arith.constant 0 : i32
    %c0_i32_1 = arith.constant 0 : i32
    return %c0_i32, %c0_i32_0 : i32, i32
  }
  func.func @transform_3(%arg0: i32, %arg1: i32) -> (i32, i32) {
    %c0_i32 = arith.constant 0 : i32
    %c0_i32_0 = arith.constant 0 : i32
    %c0_i32_1 = arith.constant 0 : i32
    return %c0_i32, %c0_i32_0 : i32, i32
  }
  func.func @transform_4(%arg0: i32, %arg1: i32) -> (i32, i32) {
    %c0_i32 = arith.constant 0 : i32
    %c0_i32_0 = arith.constant 0 : i32
    %c0_i32_1 = arith.constant 0 : i32
    return %c0_i32, %c0_i32_0 : i32, i32
  }
  func.func @transform_5(%arg0: i32, %arg1: i32) -> (i32, i32, i32) {
    %c0_i32 = arith.constant 0 : i32
    %c0_i32_0 = arith.constant 0 : i32
    return %arg0, %c0_i32, %arg1 : i32, i32, i32
  }
}

</mosaic_0001>

<bundles_post_ra>
// kernel: rpn_forward.1
= control target key start
LH: loop header
LB: loop body
LE: loop exit
PB: predicated region body
PF: predicated region fallthrough
CT: control target
= control target key end

     0   :  { %s826_s18 = smov 0   ;;  %s828_s19 = smov 0   ;;  %s967_s0 = inlined_call_operand.vmem [shape: f32[2,36,256], index: 0, kind: input, shape index: {}]   ;;  %s968_s1 = inlined_call_operand.vmem [shape: f32[32,36], index: 1, kind: input, shape index: {}]   ;;  %s969_s2 = inlined_call_operand.vmem [shape: f32[32,1], index: 2, kind: input, shape index: {}]   ;;  %s970_s3 = inlined_call_operand.vmem [shape: f32[54,32], index: 3, kind: input, shape index: {}]   ;;  %s971_s4 = inlined_call_operand.vmem [shape: f32[54,1], index: 4, kind: input, shape index: {}]   ;;  %s972_s5 = inlined_call_operand.vmem [shape: f32[2,54,256], index: 5, kind: output, shape index: {}]  }
   0x1   :  { %s830_s20 = smov 0  }
   0x2 LB: > { %s27_s21 = sadd.s32 1, %s788_s19  ;;  %p702_p0 = scmp.ge.s32.totalorder %s792_s20, 1  ;;  %s792_s20 = sphi %s830_s20, %s15_s20   ;;  %s788_s19 = sphi %s828_s19, %s974_s19   ;;  %s784_s18 = sphi %s826_s18, %s973_s18  }
   0x3   : > { %p29_p1 = scmp.ge.s32.totalorder %s27_s21, 2  ;;  %p208_p2 = scmp.lt.s32.totalorder %s792_s20, 3 }
   0x5   : > { %s976_s21 = smov (%p29_p1, %s27_s21), 0  ;;  %p209_p3 = pnand %p702_p0, %p208_p2 }
   0x6   : > { %p245_p4 = scmp.lt.s32.totalorder (!%p209_p3), %s784_s18, 1  ;;  %v794_v0 = vmov (!%p209_p3), 0.0   ;;  %v278_v1 = vld [vmem:[%s969_s2] sm:$0xff] (!%p209_p3)  ;;  %v795_v2 = vmov (!%p209_p3), 0   ;;  %v280_v3 = vld [vmem:[%s969_s2 + $0x10] sm:$0xff] (!%p209_p3)  ;;  %v279_v4 = vld [vmem:[%s969_s2 + $0x8] sm:$0xff] (!%p209_p3) }
   0x7   : > { %212 = sbr.rel (%p209_p3) target bundleno = 502 (0x1f6), region = 40  ;;  %386 = vmatprep.mubr.f32.mxu0 (!%p209_p3), %v794_v0  ;;  %560 = vmatprep.mubr.f32.mxu1 (!%p209_p3), %v794_v0  ;;  %v281_v5 = vld [vmem:[%s969_s2 + $0x18] sm:$0xff] (!%p209_p3)  ;;  %v426_v6 = vld [vmem:[%s971_s4] sm:$0xff] (!%p209_p3)  ;;  %v427_v18 = vld [vmem:[%s971_s4 + $0x8] sm:$0xff] (!%p209_p3)  ;;  %vm315_vm0 = vcmask (!%p209_p3), 1043456   ;;  %vm302_vm1 = vcmask (!%p209_p3), 293888  }
   0x8   : > { %768 = vset.pattern.permute.xlu0 (!%p209_p3), %v795_v2  ;;  %769 = vset.pattern.permute.xlu1 (!%p209_p3), %v795_v2  ;;  %v428_v20 = vld [vmem:[%s971_s4 + $0x10] sm:$0xff] (!%p209_p3)  ;;  %v429_v22 = vld [vmem:[%s971_s4 + $0x18] sm:$0xff] (!%p209_p3)  ;;  %v430_v24 = vld [vmem:[%s971_s4 + $0x20] sm:$0xff] (!%p209_p3)  ;;  %vm468_vm2 = vcmask (!%p209_p3), 261120  }
   0x9   : > { %284 = vperm.xlu0 (!%p209_p3), %768, %v278_v1   ;;  %294 = vperm.xlu1 (!%p209_p3), %769, %v280_v3   ;;  %v274_v25 = vld [vmem:[%s968_s1] sm:$0xff] (!%p209_p3)  ;;  %v431_v26 = vld [vmem:[%s971_s4 + $0x28] sm:$0xff] (!%p209_p3)  ;;  %v432_v27 = vld [vmem:[%s971_s4 + $0x30] sm:$0x3f] (!%p209_p3) }
   0xa   : > { %v275_v28 = vld [vmem:[%s968_s1 + $0x8] sm:$0xff] (!%p209_p3)  ;;  %v276_v29 = vld [vmem:[%s968_s1 + $0x10] sm:$0xff] (!%p209_p3)  ;;  %v277_v30 = vld [vmem:[%s968_s1 + $0x18] sm:$0xff] (!%p209_p3) }
   0xb   : > { %v419_v63 = vld [vmem:[%s970_s3] sm:$0xff] (!%p209_p3)  ;;  %v420_v1 = vld [vmem:[%s970_s3 + $0x8] sm:$0xff] (!%p209_p3)  ;;  %v421_v2 = vld [vmem:[%s970_s3 + $0x10] sm:$0xff] (!%p209_p3) }
   0xc   : > { %v422_v3 = vld [vmem:[%s970_s3 + $0x18] sm:$0xff] (!%p209_p3) }
   0xd   : > { %289 = vperm.xlu0 (!%p209_p3), %768, %v279_v4   ;;  %299 = vperm.xlu1 (!%p209_p3), %769, %v281_v5   ;;  %v423_v4 = vld [vmem:[%s970_s3 + $0x20] sm:$0xff] (!%p209_p3)  ;;  %v424_v5 = vld [vmem:[%s970_s3 + $0x28] sm:$0xff] (!%p209_p3) }
   0xe   : > { %s978_s18 = smov (!%p245_p4, %s784_s18), 1 }
   0xf   : > { %s740_s26 = smul.u32 80, %s978_s18 }
  0x10   : > { %s741_s28 = smul.u32 112, %s978_s18 }
  0x11   : > { %s252_s8 = scalar_lea.vmem %s967_s0, %s740_s26  ;;  %435 = vperm.xlu0 %768, %v426_v6   ;;  %440 = vperm.xlu1 %769, %v427_v18   ;;  %v425_v6 = vld [vmem:[%s970_s3 + $0x30] sm:$0x3f] }
  0x12   : > { %v265_v7 = vld [vmem:[%s252_s8 + $0x8] sm:$0xff]  ;;  %v267_v8 = vld [vmem:[%s252_s8 + $0x18] sm:$0xff]  ;;  %v264_v9 = vld [vmem:[%s252_s8] sm:$0xff]  ;;  %s942_s6 = scalar_lea.vmem %s972_s5, %s741_s28 }
  0x13   : > { %v720_v10 = vpack.c.bf16 %v267_v8, %v265_v7  ;;  %v266_v11 = vld [vmem:[%s252_s8 + $0x10] sm:$0xff]  ;;  %v269_v12 = vld [vmem:[%s252_s8 + $0x28] sm:$0xff]  ;;  %v271_v13 = vld [vmem:[%s252_s8 + $0x38] sm:$0xff] }
  0x14   : > { %v722_v14 = vpack.c.bf16 %v266_v11, %v264_v9  ;;  %v724_v15 = vpack.c.bf16 %v271_v13, %v269_v12  ;;  %v268_v16 = vld [vmem:[%s252_s8 + $0x20] sm:$0xff]  ;;  %v270_v17 = vld [vmem:[%s252_s8 + $0x30] sm:$0xff]  ;;  %v273_v21 = vld [vmem:[%s252_s8 + $0x48] sm:$0xf] }
  0x15   : > { %721 = vmatprep.subr.bf16.mxu0 %v720_v10  ;;  %v726_v19 = vpack.c.bf16 %v270_v17, %v268_v16  ;;  %445 = vperm.xlu0 %768, %v428_v20   ;;  %v272_v23 = vld [vmem:[%s252_s8 + $0x40] sm:$0xf] }
  0x16   : > { %723 = vmatpush1.bf16.msra.mxu0 %v722_v14  ;;  %450 = vperm.xlu1 %769, %v429_v22  }
  0x17   : > { %725 = vmatprep.subr.bf16.mxu0 %v724_v15 }
  0x19   : > { %455 = vperm.xlu0 %768, %v430_v24  }
  0x1a   : > { %727 = vmatpush1.bf16.msra.mxu0 %v726_v19  ;;  %460 = vperm.xlu1 %769, %v431_v26  }
  0x1b   : > { %705 = vmatprep.subr.msk.mxu0 %vm315_vm0, %v273_v21 }
  0x1d   : > { %465 = vperm.xlu0 %768, %v432_v27  }
  0x1e   : > { %706 = vmatpush1.msk.msra.mxu0 %vm315_vm0, %v272_v23 }
  0x1f   : > { %707 = vmatmul.mubr.msk.f32.vlgmr.msra.gmra.mrb[0].mxu0 %vm302_vm1, %v274_v25 }
  0x20   : > { %392 = vmatprep.mubr.f32.mxu0 %v794_v0 }
  0x23   : > { %708 = vmatmul.mubr.msk.f32.gmra.mrb[2].mxu0 %vm302_vm1, %v275_v28 }
  0x24   : > { %398 = vmatprep.mubr.f32.mxu0 %v794_v0 }
  0x27   : > { %709 = vmatmul.mubr.msk.f32.gmra.mrb[4].mxu0 %vm302_vm1, %v276_v29 }
  0x28   : > { %404 = vmatprep.mubr.f32.mxu0 %v794_v0 }
  0x2b   : > { %710 = vmatmul.mubr.msk.f32.gmra.mrb[6].mxu0 %vm302_vm1, %v277_v30 }
  0x2c   : > { %554 = vmatprep.mubr.f32.mxu0 %v794_v0 }
  0x88   : > { %v285_v31 = vpop.permute.xlu0 %284  ;;  %v295_v40 = vpop.permute.xlu1 %294 }
  0x8c   : > { %v290_v35 = vpop.permute.xlu0 %289  ;;  %v300_v51 = vpop.permute.xlu1 %299 }
  0x90   : > { %v436_v7 = vpop.permute.xlu0 %435  ;;  %v441_v8 = vpop.permute.xlu1 %440 }
  0x94   : > { %v446_v16 = vpop.permute.xlu0 %445 }
  0x95   : > { %v451_v21 = vpop.permute.xlu1 %450 }
  0x98   : > { %v456_v26 = vpop.permute.xlu0 %455 }
  0xf2   : > { %v388_v32 = vpop.f32.mrb[0].mxu0 }
  0xf3   : > { %v390_v33 = vpop.f32.mrb[1].mxu0  ;;  %v389_v34 = vadd.f32 %v388_v32, %v285_v31 }
  0xf4   : > { %v391_v36 = vadd.f32 %v390_v33, %v285_v31  ;;  %v461_v31 = vpop.permute.xlu1 %460 }
  0xf5   : > { %v411_v42 = vmax.f32 %v389_v34, 0.0 }
  0xf6   : > { %v394_v37 = vpop.f32.mrb[2].mxu0  ;;  %v412_v44 = vmax.f32 %v391_v36, 0.0  ;;  %v466_v36 = vpop.permute.xlu0 %465 }
  0xf7   : > { %v395_v38 = vadd.f32 %v394_v37, %v290_v35  ;;  %v396_v39 = vpop.f32.mrb[3].mxu0 }
  0xf8   : > { %v397_v41 = vadd.f32 %v396_v39, %v290_v35 }
  0xf9   : > { %v413_v43 = vmax.f32 %v395_v38, 0.0 }
  0xfa   : > { %v414_v45 = vmax.f32 %v397_v41, 0.0  ;;  %v400_v46 = vpop.f32.mrb[4].mxu0 }
  0xfb   : > { %v730_v47 = vpack.c.bf16 %v413_v43, %v411_v42  ;;  %v402_v48 = vpop.f32.mrb[5].mxu0  ;;  %v401_v50 = vadd.f32 %v400_v46, %v295_v40 }
  0xfc   : > { %v728_v49 = vpack.c.bf16 %v414_v45, %v412_v44  ;;  %v403_v52 = vadd.f32 %v402_v48, %v295_v40 }
  0xfd   : > { %v415_v57 = vmax.f32 %v401_v50, 0.0 }
  0xfe   : > { %v406_v53 = vpop.f32.mrb[6].mxu0  ;;  %729 = vmatprep.subr.bf16.mxu0 %v728_v49  ;;  %736 = vmatprep.subr.bf16.mxu1 %v728_v49  ;;  %v416_v59 = vmax.f32 %v403_v52, 0.0 }
  0xff   : > { %v407_v54 = vadd.f32 %v406_v53, %v300_v51  ;;  %v408_v55 = vpop.f32.mrb[7].mxu0  ;;  %731 = vmatpush1.bf16.msra.mxu0 %v730_v47  ;;  %738 = vmatpush1.bf16.msra.mxu1 %v730_v47 }
 0x100   : > { %v409_v56 = vadd.f32 %v408_v55, %v300_v51 }
 0x101   : > { %v417_v58 = vmax.f32 %v407_v54, 0.0 }
 0x102   : > { %v418_v60 = vmax.f32 %v409_v56, 0.0 }
 0x103   : > { %v734_v61 = vpack.c.bf16 %v417_v58, %v415_v57 }
 0x104   : > { %v732_v62 = vpack.c.bf16 %v418_v60, %v416_v59 }
 0x106   : > { %733 = vmatprep.subr.bf16.mxu0 %v732_v62  ;;  %737 = vmatprep.subr.bf16.mxu1 %v732_v62 }
 0x107   : > { %735 = vmatpush1.bf16.msra.mxu0 %v734_v61  ;;  %739 = vmatpush1.bf16.msra.mxu1 %v734_v61 }
 0x10a   : > { %711 = vmatmul.mubr.msk.f32.vlgmr.msra.gmra.mrb[8].mxu0 %vm468_vm2, %v419_v63  ;;  %712 = vmatmul.mubr.msk.f32.vlgmr.msra.gmra.mrb[0].mxu1 %vm468_vm2, %v420_v1 }
 0x10b   : > { %566 = vmatprep.mubr.f32.mxu1 %v794_v0 }
 0x10e   : > { %713 = vmatmul.mubr.msk.f32.gmra.mrb[2].mxu1 %vm468_vm2, %v421_v2 }
 0x10f   : > { %572 = vmatprep.mubr.f32.mxu1 %v794_v0 }
 0x112   : > { %714 = vmatmul.mubr.msk.f32.gmra.mrb[4].mxu1 %vm468_vm2, %v422_v3 }
 0x113   : > { %578 = vmatprep.mubr.f32.mxu1 %v794_v0 }
 0x116   : > { %715 = vmatmul.mubr.msk.f32.gmra.mrb[6].mxu1 %vm468_vm2, %v423_v4 }
 0x117   : > { %584 = vmatprep.mubr.f32.mxu1 %v794_v0 }
 0x11a   : > { %716 = vmatmul.mubr.msk.f32.gmra.mrb[8].mxu1 %vm468_vm2, %v424_v5 }
 0x11b   : > { %590 = vmatprep.mubr.f32.mxu1 %v794_v0 }
 0x11e   : > { %717 = vmatmul.mubr.msk.f32.gmra.mrb[10].mxu1 %vm468_vm2, %v425_v6 }
 0x1dd   : > { %v556_v9 = vpop.f32.mrb[8].mxu0  ;;  %v562_v0 = vpop.f32.mrb[0].mxu1 }
 0x1de   : > { %v557_v10 = vadd.f32 %v556_v9, %v436_v7  ;;  %v563_v11 = vadd.f32 %v562_v0, %v441_v8  ;;  %v558_v12 = vpop.f32.mrb[9].mxu0  ;;  %v564_v13 = vpop.f32.mrb[1].mxu1 }
 0x1df   : > { %v559_v14 = vadd.f32 %v558_v12, %v436_v7  ;;  %v565_v15 = vadd.f32 %v564_v13, %v441_v8 }
 0x1e0   : > { %597 = vst [vmem:[%s942_s6] sm:$0xff] %v557_v10  ;;  %599 = vst [vmem:[%s942_s6 + $0x10] sm:$0xff] %v563_v11 }
 0x1e1   : > { %598 = vst [vmem:[%s942_s6 + $0x8] sm:$0xff] %v559_v14  ;;  %600 = vst [vmem:[%s942_s6 + $0x18] sm:$0xff] %v565_v15  ;;  %v568_v17 = vpop.f32.mrb[2].mxu1 }
 0x1e2   : > { %v569_v18 = vadd.f32 %v568_v17, %v446_v16  ;;  %v570_v19 = vpop.f32.mrb[3].mxu1 }
 0x1e3   : > { %v571_v20 = vadd.f32 %v570_v19, %v446_v16 }
 0x1e4   : > { %601 = vst [vmem:[%s942_s6 + $0x20] sm:$0xff] %v569_v18 }
 0x1e5   : > { %602 = vst [vmem:[%s942_s6 + $0x28] sm:$0xff] %v571_v20  ;;  %v574_v22 = vpop.f32.mrb[4].mxu1 }
 0x1e6   : > { %v575_v23 = vadd.f32 %v574_v22, %v451_v21  ;;  %v576_v24 = vpop.f32.mrb[5].mxu1 }
 0x1e7   : > { %v577_v25 = vadd.f32 %v576_v24, %v451_v21 }
 0x1e8   : > { %603 = vst [vmem:[%s942_s6 + $0x30] sm:$0xff] %v575_v23 }
 0x1e9   : > { %604 = vst [vmem:[%s942_s6 + $0x38] sm:$0xff] %v577_v25  ;;  %v580_v27 = vpop.f32.mrb[6].mxu1 }
 0x1ea   : > { %v581_v28 = vadd.f32 %v580_v27, %v456_v26  ;;  %v582_v29 = vpop.f32.mrb[7].mxu1 }
 0x1eb   : > { %v583_v30 = vadd.f32 %v582_v29, %v456_v26 }
 0x1ec   : > { %605 = vst [vmem:[%s942_s6 + $0x40] sm:$0xff] %v581_v28 }
 0x1ed   : > { %606 = vst [vmem:[%s942_s6 + $0x48] sm:$0xff] %v583_v30  ;;  %v586_v32 = vpop.f32.mrb[8].mxu1 }
 0x1ee   : > { %v587_v33 = vadd.f32 %v586_v32, %v461_v31  ;;  %v588_v34 = vpop.f32.mrb[9].mxu1 }
 0x1ef   : > { %v589_v35 = vadd.f32 %v588_v34, %v461_v31 }
 0x1f0   : > { %607 = vst [vmem:[%s942_s6 + $0x50] sm:$0xff] %v587_v33 }
 0x1f1   : > { %608 = vst [vmem:[%s942_s6 + $0x58] sm:$0xff] %v589_v35  ;;  %v592_v37 = vpop.f32.mrb[10].mxu1 }
 0x1f2   : > { %v593_v38 = vadd.f32 %v592_v37, %v466_v36  ;;  %v594_v39 = vpop.f32.mrb[11].mxu1 }
 0x1f3   : > { %v595_v40 = vadd.f32 %v594_v39, %v466_v36 }
 0x1f4   : > { %609 = vst [vmem:[%s942_s6 + $0x60] sm:$0x3f] %v593_v38 }
 0x1f5   : > { %610 = vst [vmem:[%s942_s6 + $0x68] sm:$0x3f] %v595_v40 }
 0x1f6 PF: > { %s15_s20 = sadd.s32 1, %s792_s20   ;;  %s973_s18 = smov %s788_s19 }
 0x1f7   : > { %p12_p5 = scmp.ge.s32.totalorder %s15_s20, 4   ;;  %s974_s19 = smov %s976_s21 }
 0x1f9   :  { %14 = sbr.rel (!%p12_p5) target bundleno = 2 (0x2), region = 70 }

</bundles_post_ra>
